<compile_context>
chip_gen: v7x
topology: tpu7x:2x2x1
jax: 0.10.0
libtpu: 0.0.40
codegen_flags: <defaults>
</compile_context>

<pallas_src>
import functools
import math

import jax
import jax.numpy as jnp
from jax.experimental import pallas as pl
from jax.experimental.pallas import tpu as pltpu

BN_EPS = 1e-5  # F.batch_norm default eps; running_mean = running_var = 0


def conv_bn_relu_kernel(x_ref, w_ref, o_ref, *, upcast_x):
    # x_ref: (Cp, TM) activation tile (spatial axis on lanes)
    # w_ref: (Coutp, Cp) weight, batch-norm scale 1/sqrt(eps) folded in (resident)
    # o_ref: (Coutp, TM) output tile in the original dtype
    x = x_ref[...]
    if upcast_x:
        x = x.astype(jnp.float32)  # torch's x.float() path (non-f32, non-native dtypes)
    y = jnp.dot(w_ref[...], x, preferred_element_type=jnp.float32)  # MXU
    o_ref[...] = jnp.maximum(y, 0.0).astype(o_ref.dtype)            # ReLU + downcast


def _round_up(x, m):
    return ((x + m - 1) // m) * m


def _sublane_multiple(dtype):
    # 8 for f32, 16 for bf16, 32 for int8/fp8 (packed sublane granularity)
    return max(8, 32 // jnp.dtype(dtype).itemsize)


def _vmem_budgets():
    """Generation-aware VMEM sizing: (tile budget for _pick_tm, vmem_limit_bytes)."""
    cap = None
    try:
        info = pltpu.get_tpu_info()
        cap = int(getattr(info, "vmem_capacity_bytes", 0)) or None
    except Exception:
        cap = None
    if cap is None:
        cap = 64 * 1024 * 1024  # conservative fallback: assume v7x-sized VMEM
    tile_budget = min(cap // 2, 96 * 1024 * 1024)        # v7x ~32MiB, v5e/v6e ~64MiB
    vmem_limit = min((cap * 3) // 4, 100 * 1024 * 1024)  # v7x ~48MiB, v5e/v6e ~96MiB
    return tile_budget, vmem_limit


def _pick_tm(M, N, Cp, Coutp, x_bytes, out_bytes, w_bytes, budget_bytes):
    """Largest lane tile (multiple of 128) whose double-buffered working set fits
    the VMEM budget.  The spatial tail is handled by a partial last block inside
    the kernel (masked store), never by padding M in HBM."""
    if M <= 128:
        return M  # full-dim lane block (exempt from the 128-divisibility rule)
    per_col = 2 * (Cp * x_bytes + Coutp * out_bytes)  # double-buffered x + out tiles
    fixed = 2 * Cp * Coutp * w_bytes                  # small resident weight
    avail = max(budget_bytes - fixed, per_col * 128)
    tm = (avail // per_col) // 128 * 128
    tm = max(128, min(tm, (M // 128) * 128))
    # v7x megacore: 2 TensorCores are sharded over the parallel grid axes.  If the
    # batch axis alone can't feed both, split the spatial axis into >= 2 steps.
    if N == 1 and tm >= 1024 and pl.cdiv(M, tm) == 1:
        tm = max(512, _round_up(pl.cdiv(M, 2), 128))
    return tm


def basic_conv2d(x, feature_weight, *, exact_float32=False):
    """x: (N, C, H, W).  feature_weight: (Cout, C, 1, 1) float32.

    Reproduces BasicConv2d.forward:
      x = conv2d(x.float(), W, stride=1, padding=0)        # 1x1 conv
      x = batch_norm(x, mean=0, var=0, training=False)     # = x * rsqrt(eps)
      x = relu(x)
      x = x.to(original_dtype)
    Set exact_float32=True to force the f32 MXU path for bit-closeness to torch
    even for bf16 inputs (default uses the native bf16 MXU path for perf).
    """
    orig_dtype = x.dtype
    N, C, H, W = x.shape
    Cout = feature_weight.shape[0]
    M = H * W

    # Fold the constant batch-norm scale 1/sqrt(0 + eps) into the tiny weight once
    # at trace time instead of rescaling every output tile in-kernel.
    inv_std = 1.0 / math.sqrt(BN_EPS)
    w2d = feature_weight.reshape(Cout, C).astype(jnp.float32) * inv_std

    # MXU operand dtype: bf16 inputs stay bf16 (native MXU path, no in-kernel
    # upcast); everything else computes in f32 (matching torch's x.float()).
    if orig_dtype == jnp.bfloat16 and not exact_float32:
        op_dtype = jnp.bfloat16
        upcast_x = False
    else:
        op_dtype = jnp.float32
        upcast_x = orig_dtype != jnp.float32
    w2d = w2d.astype(op_dtype)

    x_bytes = jnp.dtype(orig_dtype).itemsize
    out_bytes = x_bytes
    w_bytes = jnp.dtype(op_dtype).itemsize

    # Pad channels only when they aren't sublane-aligned for their dtype; typical
    # conv channel counts already are, so the common case adds no HBM passes.
    sub_in = _sublane_multiple(op_dtype)
    sub_out = _sublane_multiple(orig_dtype)
    Cp = C if C % sub_in == 0 else _round_up(C, sub_in)
    Coutp = Cout if Cout % sub_out == 0 else _round_up(Cout, sub_out)

    budget, vmem_limit = _vmem_budgets()
    TM = _pick_tm(M, N, Cp, Coutp, x_bytes, out_bytes, w_bytes, budget)
    grid_m = pl.cdiv(M, TM)  # last block may be partial; Pallas masks its store
    grid = (N, grid_m)

    x3 = x.reshape(N, C, M)  # contiguous view, no transpose
    if Cp != C:
        x3 = jnp.pad(x3, ((0, 0), (0, Cp - C), (0, 0)))
    if Coutp != Cout or Cp != C:
        w2d = jnp.pad(w2d, ((0, Coutp - Cout), (0, Cp - C)))

    x_spec_kwargs = {}
    if TM <= 512 and grid_m >= 3:
        # Many short steps: per-tile compute is tiny, so hide exposed DMA latency
        # with a third activation buffer (negligible VMEM cost at these tile sizes).
        x_spec_kwargs["pipeline_mode"] = pl.Buffered(3)

    in_specs = [
        pl.BlockSpec((None, Cp, TM), lambda n, m: (n, 0, m), **x_spec_kwargs),
        pl.BlockSpec((Coutp, Cp), lambda n, m: (0, 0)),
    ]
    out_spec = pl.BlockSpec((None, Coutp, TM), lambda n, m: (n, 0, m))

    cost = pl.CostEstimate(
        flops=2 * N * Cout * C * M,
        transcendentals=0,
        bytes_accessed=(N * C * M * x_bytes + N * Cout * M * out_bytes
                        + Cout * C * w_bytes),
    )

    out = pl.pallas_call(
        functools.partial(conv_bn_relu_kernel, upcast_x=upcast_x),
        out_shape=jax.ShapeDtypeStruct((N, Coutp, M), orig_dtype),
        grid_spec=pltpu.PrefetchScalarGridSpec(
            num_scalar_prefetch=0,
            grid=grid,
            in_specs=in_specs,
            out_specs=out_spec,
        ),
        compiler_params=pltpu.CompilerParams(
            dimension_semantics=("parallel", "parallel"),
            vmem_limit_bytes=vmem_limit,
        ),
        cost_estimate=cost,
    )(x3, w2d)

    if Coutp != Cout:
        out = out[:, :Cout, :]
    return out.reshape(N, Cout, H, W)


if __name__ == "__main__":
    key = jax.random.PRNGKey(0)
    kx, kw = jax.random.split(key)

    N, C, H, W = 2, 4, 16, 16
    x = jax.random.normal(kx, (N, C, H, W), dtype=jnp.float32)
    # deterministic stand-in for torch.randn(C, C, 1, 1).float()
    feature_weight = jax.random.normal(kw, (C, C, 1, 1), dtype=jnp.float32)

    out = basic_conv2d(x, feature_weight)
    jax.block_until_ready(out)

    # sanity check against a pure-JAX reference (conv -> bn(eps) -> relu -> cast)
    ref = jnp.einsum("nchw,oc->nohw", x.astype(jnp.float32),
                     feature_weight.reshape(C, C))
    ref = jnp.maximum(ref / jnp.sqrt(BN_EPS), 0.0).astype(x.dtype)
    assert out.shape == (N, C, H, W)
    assert jnp.allclose(out, ref, rtol=1e-4, atol=1e-3), float(
        jnp.max(jnp.abs(out - ref)))

    print("KERNEL_OK")
</pallas_src>

<mosaic_0001>
module attributes {stable_mosaic.version = 11 : i64} {
  func.func @conv_bn_relu_kernel(%arg0: i32, %arg1: i32, %arg2: memref<1x8x256xf32, #tpu.memory_space<vmem>>, %arg3: memref<8x8xf32, #tpu.memory_space<vmem>>, %arg4: memref<1x8x256xf32, #tpu.memory_space<vmem>>) attributes {dimension_semantics = [#tpu.dimension_semantics<parallel>, #tpu.dimension_semantics<parallel>], iteration_bounds = array<i64: 2, 1>, scalar_prefetch = 0 : i64, scratch_operands = 0 : i64, tpu.core_type = #tpu.core_type<tc>, window_params = [{transform_indices = @transform_0, window_bounds = array<i64: 1, 8, 256>}, {pipeline_mode = #tpu.pipeline_mode<synchronous>, transform_indices = @transform_1, window_bounds = array<i64: 8, 8>}, {transform_indices = @transform_2, window_bounds = array<i64: 1, 8, 256>}]} {
    %c0 = arith.constant 0 : index
    %c0_0 = arith.constant 0 : index
    %c0_1 = arith.constant 0 : index
    %0 = vector.load %arg2[%c0, %c0_0, %c0_1] : memref<1x8x256xf32, #tpu.memory_space<vmem>>, vector<1x8x256xf32>
    %1 = vector.shape_cast %0 : vector<1x8x256xf32> to vector<8x256xf32>
    %c0_2 = arith.constant 0 : index
    %c0_3 = arith.constant 0 : index
    %2 = vector.load %arg3[%c0_2, %c0_3] : memref<8x8xf32, #tpu.memory_space<vmem>>, vector<8x8xf32>
    %cst = arith.constant dense<0.000000e+00> : vector<8x256xf32>
    %3 = tpu.matmul %2, %1, %cst {dimension_numbers = #tpu.dot_dimension_numbers<[1], [0], [0], [1], [0, 0, 1, 1], [], []>} : vector<8x8xf32>, vector<8x256xf32>, vector<8x256xf32> -> vector<8x256xf32>
    %cst_4 = arith.constant 0.000000e+00 : f32
    %4 = vector.broadcast %cst_4 : f32 to vector<8x256xf32>
    %5 = arith.maximumf %3, %4 : vector<8x256xf32>
    %c0_5 = arith.constant 0 : index
    %c0_6 = arith.constant 0 : index
    %c0_7 = arith.constant 0 : index
    %6 = vector.load %arg4[%c0_5, %c0_6, %c0_7] : memref<1x8x256xf32, #tpu.memory_space<vmem>>, vector<1x8x256xf32>
    %7 = vector.shape_cast %6 : vector<1x8x256xf32> to vector<8x256xf32>
    %8 = vector.shape_cast %5 : vector<8x256xf32> to vector<1x8x256xf32>
    tpu.vector_store %arg4[%c0_5, %c0_6, %c0_7], %8 {strides = array<i32>} : memref<1x8x256xf32, #tpu.memory_space<vmem>>, vector<1x8x256xf32>,
    return
  }
  func.func @transform_0(%arg0: i32, %arg1: i32) -> (i32, i32, i32) {
    %c0_i32 = arith.constant 0 : i32
    %c0_i32_0 = arith.constant 0 : i32
    return %arg0, %c0_i32, %arg1 : i32, i32, i32
  }
  func.func @transform_1(%arg0: i32, %arg1: i32) -> (i32, i32) {
    %c0_i32 = arith.constant 0 : i32
    %c0_i32_0 = arith.constant 0 : i32
    %c0_i32_1 = arith.constant 0 : i32
    return %c0_i32, %c0_i32_0 : i32, i32
  }
  func.func @transform_2(%arg0: i32, %arg1: i32) -> (i32, i32, i32) {
    %c0_i32 = arith.constant 0 : i32
    %c0_i32_0 = arith.constant 0 : i32
    return %arg0, %c0_i32, %arg1 : i32, i32, i32
  }
}

</mosaic_0001>

<bundles_post_ra>
// kernel: tpu_custom_call.1
= control target key start
LH: loop header
LB: loop body
LE: loop exit
PB: predicated region body
PF: predicated region fallthrough
CT: control target
= control target key end

     0   :  { %7 = vsyncpa [#allocation3], 0  ;;  %s861_s0 = inlined_call_operand.hbm [shape: f32[2,8,256], index: 0, kind: input, shape index: {}]   ;;  %s862_s1 = inlined_call_operand.hbm [shape: f32[8,8], index: 1, kind: input, shape index: {}]   ;;  %s863_s2 = inlined_call_operand.hbm [shape: f32[2,8,256], index: 2, kind: output, shape index: {}]  }
   0x1   :  { %9 = vsyncpa [#allocation3 + $0x1], 0 }
   0x2   :  { %10 = vsyncpa [#allocation6], 0 }
   0x3   :  { %11 = vsyncpa [#allocation4], 0 }
   0x4   :  { %13 = vsyncpa [#allocation4 + $0x1], 0  ;;  %s645_s9 = smov 0   ;;  %s647_s10 = smov 0  }
   0x5   :  { %s649_s11 = smov 0   ;;  %s651_s12 = smov 0  }
   0x6   :  { %s653_s13 = smov 0   ;;  %s655_s14 = smov 0  }
   0x7 LB: > { %s386_s15 = sadd.s32 4294967295, %s624_s14   ;;  %s387_s16 = sadd.s32 4294967294, %s624_s14   ;;  %s624_s14 = sphi %s655_s14, %s19_s14   ;;  %s620_s13 = sphi %s653_s13, %s888_s13   ;;  %s616_s12 = sphi %s651_s12, %s887_s12   ;;  %s612_s11 = sphi %s649_s11, %s886_s11   ;;  %s608_s10 = sphi %s647_s10, %s885_s10   ;;  %s604_s9 = sphi %s645_s9, %s884_s9  }
   0x8   : > { %p53_p0 = scmp.ne.s32.totalorder %s608_s10, %s604_s9  ;;  %p679_p1 = scmp.eq.s32.totalorder %s386_s15, 0 }
   0x9   : > { %p683_p2 = scmp.eq.s32.totalorder %s386_s15, 1  ;;  %p106_p3 = scmp.eq.s32.totalorder %s387_s16, 1 }
   0xa   : > { %s868_s17 = scalar_select %p679_p1, 1, 0 }
   0xb   : > { %s869_s18 = scalar_select %p683_p2, 1, 0 }
   0xc   : > { %p689_p4 = por %p679_p1, %p53_p0  ;;  %p388_p5 = scmp.ge.s32.totalorder %s624_s14, 1 }
   0xd   : > { %p694_p6 = por %p106_p3, %p53_p0  ;;  %p113_p7 = scmp.lt.s32.totalorder %s624_s14, 3 }
   0xe   : > { %s870_s19 = scalar_select %p689_p4, 1, 0 }
   0xf   : > { %s871_s20 = scalar_select %p694_p6, 1, 0 }
  0x10   : > { %p699_p8 = pnand %p388_p5, %p113_p7  ;;  %s626_s22 = smov [#allocation5]  }
  0x11   : > { %s126_s23 = sshll.u32 %s626_s22, 4  ;;  %s31_s25 = sadd.s32 1, %s620_s13  ;;  %s127_s23 = int_to_ptr.vmem [resolvable:$true] %s126_s23 }
  0x12   : > { %s872_s21 = scalar_select %p699_p8, 1, 0 }
  0x13   : > { %p414_p10 = pneg %p699_p8  ;;  %s40_s26 = sadd.s32 1, %s612_s11 }
  0x14   : > { %p714_p12 = scmp.ge.s32.totalorder %s31_s25, 2  ;;  %s480_s30 = scalar_lea.hbm %s862_s1, 128 }
  0x15   : > { %p708_p11 = pnand %p414_p10, %p679_p1  ;;  %p481_p13 = scmp.ne.s32.totalorder %s862_s1, %s480_s30 }
  0x16   : > { %s874_s27 = scalar_select %p714_p12, 1, 0 }
  0x17   : > { %p482_p0 = pneg %p708_p11  ;;  %p487_p7 = scmp.lt.u32.totalorder %s480_s30, %s862_s1 }
  0x19   : > { %p483_p3 = pnand %p482_p0, %p481_p13 }
  0x1b   : > { %p484_p5 = pneg %p483_p3 }
  0x1d   : > { %p489_p10 = pnand %p487_p7, %p484_p5 }
  0x1f   : > { %492 = shalt.err (!%p489_p10)
}
  0x20   : > { %s493_s7 = scalar_lea.vmem %s127_s23, 128  ;;  %p501_p4 = scmp.lt.s32.totalorder %s127_s23, %s127_s23 }
  0x21   : > { %p494_p9 = scmp.ne.s32.totalorder %s127_s23, %s493_s7  ;;  %p502_p8 = scmp.lt.s32.totalorder %s493_s7, %s493_s7 }
  0x23   : > { %p496_p6 = pnand %p494_p9, %p482_p0  ;;  %p503_p2 = por %p502_p8, %p501_p4 }
  0x25   : > { %p497_p1 = pneg %p496_p6 }
  0x27   : > { %p504_p12 = pnand %p503_p2, %p497_p1 }
  0x29   : > { %507 = shalt.err (!%p504_p12)
}
  0x2a   : > { %417 = dma.hbm_to_vmem [thread:$0]  (!%p708_p11), %s862_s1, 128, %s127_s23, [#allocation6]  }
  0x2b   : > { %p875_p4 = scmp.ne.s32.totalorder %s874_s27, 0  ;;  %p47_p1 = scmp.ne.s32.totalorder %s612_s11, %s608_s10 }
  0x2c   : > { %p48_p2 = scmp.eq.s32.totalorder %s624_s14, 0  ;;  %p427_p6 = scmp.lt.s32.totalorder %s624_s14, 2 }
  0x2d   : > { %s890_s25 = smov (%p875_p4, %s31_s25), 0  ;;  %p876_p12 = scmp.ne.s32.totalorder %s869_s18, 0 }
  0x2e   : > { %s35_s16 = ssub.s32 %s620_s13, %s890_s25  ;;  %p49_p9 = por %p48_p2, %p47_p1 }
  0x2f   : > { %p38_p8 = scmp.eq.s32.totalorder %s35_s16, 0  ;;  %p746_p13 = por %p876_p12, %p47_p1 }
  0x30   : > { %s137_s24 = sand.u32 1, %s612_s11   ;;  %s404_s27 = sshll.u32 %s620_s13, 8 }
  0x31   : > { %s754_s28 = scalar_select %p38_p8, %s612_s11, %s40_s26  }
  0x32   : > { %s391_s23 = sshll.u32 %s137_s24, 4  ;;  %s760_s3 = scalar_lea.hbm %s861_s0, %s404_s27 }
  0x33   : > { %s141_s18 = scalar_lea.vmem [#allocation2], %s391_s23  ;;  %p764_p11 = pnand %p427_p6, %p49_p9 }
  0x34   : > { %s151_s4 = sshll.u32 %s141_s18, 4  ;;  %s138_s26 = scalar_lea.sflag [#allocation3], %s137_s24  ;;  %s762_s4 = int_to_ptr.vmem [resolvable:$true] %s151_s4 }
  0x35   : > { %s508_s6 = scalar_lea.hbm %s760_s3, 256  ;;  %p510_p3 = pneg %p764_p11 }
  0x36   : > { %p509_p0 = scmp.ne.s32.totalorder %s760_s3, %s508_s6  ;;  %s513_s15 = scalar_lea.hbm %s861_s0, 512 }
  0x37   : > { %p514_p10 = scmp.lt.u32.totalorder %s760_s3, %s861_s0  ;;  %p515_p4 = scmp.lt.u32.totalorder %s513_s15, %s508_s6 }
  0x38   : > { %p511_p5 = pnand %p510_p3, %p509_p0  ;;  %p517_p2 = scmp.lt.u32.totalorder %s508_s6, %s760_s3 }
  0x39   : > { %p516_p1 = por %p515_p4, %p514_p10 }
  0x3a   : > { %p512_p7 = pneg %p511_p5 }
  0x3b   : > { %p518_p6 = por %p517_p2, %p516_p1 }
  0x3d   : > { %p519_p8 = pnand %p518_p6, %p512_p7 }
  0x3f   : > { %522 = shalt.err (!%p519_p8)
}
  0x40   : > { %s523_s24 = scalar_lea.vmem %s762_s4, 256  ;;  %s627_s27 = smov [#allocation2]  }
  0x41   : > { %p524_p9 = scmp.ne.s32.totalorder %s762_s4, %s523_s24  ;;  %s528_s29 = sshll.u32 %s627_s27, 4  ;;  %s529_s29 = int_to_ptr.vmem [resolvable:$false] %s528_s29 }
  0x42   : > { %s530_s30 = scalar_lea.vmem %s529_s29, 512  ;;  %p531_p5 = scmp.lt.s32.totalorder %s762_s4, %s529_s29 }
  0x43   : > { %p526_p12 = pnand %p524_p9, %p510_p3  ;;  %p532_p10 = scmp.lt.s32.totalorder %s530_s30, %s523_s24 }
  0x45   : > { %p527_p0 = pneg %p526_p12  ;;  %p533_p4 = por %p532_p10, %p531_p5 }
  0x47   : > { %p534_p1 = pnand %p533_p4, %p527_p0 }
  0x49   : > { %537 = shalt.err (!%p534_p1)
}
  0x4a   : > { %421 = dma.hbm_to_vmem [thread:$0]  (!%p764_p11), %s760_s3, 256, %s762_s4, %s138_s26  }
  0x4b   : > { %p879_p7 = scmp.ne.s32.totalorder %s872_s21, 0 }
  0x4c   : > { %s796_s18 = sand.u32 (!%p879_p7), 1, %s608_s10   ;;  %p880_p3 = scmp.ne.s32.totalorder (!%p879_p7), %s870_s19, 0 }
  0x4d   : > { %160 = sbr.rel (%p879_p7) target bundleno = 320 (0x140), region = 28  ;;  %s395_s6 = sshll.u32 (!%p879_p7), %s796_s18, 4 }
  0x4e   : > { %s163_s7 = scalar_lea.sflag (!%p879_p7), [#allocation3], %s796_s18  ;;  %s166_s8 = scalar_lea.vmem (!%p879_p7), [#allocation2], %s395_s6 }
  0x54   : > { %591 = dma.done.wait (%p880_p3), %s163_s7, 256  }
  0x55   : > { %593 = vsyncadd (%p880_p3), %s163_s7, 4294967040  ;;  %p881_p2 = scmp.ne.s32.totalorder %s868_s17, 0 }
  0x57   : > { %595 = dma.done.wait (%p881_p2), [#allocation6], 128  }
  0x58   : > { %597 = vsyncadd (%p881_p2), [#allocation6], 4294967168  ;;  %v628_v0 = vmov 0.0   ;;  %v194_v1 = vld [vmem:[%s166_s8 + $0x8] sm:$0xff]  ;;  %v193_v2 = vld [vmem:[%s166_s8] sm:$0xff]  ;;  %vm196_vm0 = vcmask 64512  }
  0x59   : > { %264 = vmatprep.mubr.f32.mxu0 %v628_v0  ;;  %v195_v3 = vld [vmem:[#allocation5] sm:$0xff]  ;;  %200 = vmatprep.subr.mxu0 %v194_v1  ;;  %s405_s19 = sshll.u32 %s616_s12, 8  ;;  %s190_s21 = scalar_lea.vmem [#allocation7], %s395_s6 }
  0x5a   : > { %201 = vmatpush1.msra.mxu0 %v193_v2  ;;  %s292_s3 = sshll.u32 %s190_s21, 4  ;;  %s812_s5 = scalar_lea.hbm %s863_s2, %s405_s19  ;;  %s814_s3 = int_to_ptr.vmem [resolvable:$true] %s292_s3 }
  0x5b   : > { %398 = vmatmul.mubr.msk.f32.vlgmr.msra.gmra.mrb[0].mxu0 %vm196_vm0, %v195_v3  ;;  %s276_s26 = scalar_lea.sflag [#allocation4], %s796_s18  ;;  %s538_s12 = scalar_lea.vmem %s814_s3, 256 }
  0x5c   : > { %p539_p11 = scmp.ne.s32.totalorder %s814_s3, %s538_s12  ;;  %s629_s15 = smov [#allocation7]  }
  0x5d   : > { %s542_s16 = sshll.u32 %s629_s15, 4  ;;  %s543_s16 = int_to_ptr.vmem [resolvable:$false] %s542_s16 }
  0x5e   : > { %p540_p6 = pnand %p539_p11, %p746_p13  ;;  %s544_s23 = scalar_lea.vmem %s543_s16, 512 }
  0x5f   : > { %p545_p9 = scmp.lt.s32.totalorder %s814_s3, %s543_s16  ;;  %p546_p12 = scmp.lt.s32.totalorder %s544_s23, %s538_s12 }
  0x60   : > { %p541_p8 = pneg %p540_p6 }
  0x61   : > { %p547_p0 = por %p546_p12, %p545_p9 }
  0x63   : > { %p548_p5 = pnand %p547_p0, %p541_p8 }
 0x12e   : > { %v266_v4 = vpop.f32.mrb[0].mxu0 }
 0x12f   : > { %v271_v5 = vmax.f32 %v266_v4, 0.0  ;;  %v268_v6 = vpop.f32.mrb[1].mxu0 }
 0x130   : > { %v272_v7 = vmax.f32 %v268_v6, 0.0 }
 0x131   : > { %273 = vst [vmem:[%s190_s21] sm:$0xff] %v271_v5 }
 0x132   : > { %274 = vst [vmem:[%s190_s21 + $0x8] sm:$0xff] %v272_v7 }
 0x133   : > { %551 = shalt.err (!%p548_p5)
}
 0x134   : > { %s552_s24 = scalar_lea.hbm %s812_s5, 256  ;;  %s556_s30 = scalar_lea.hbm %s863_s2, 512 }
 0x135   : > { %p553_p10 = scmp.ne.s32.totalorder %s812_s5, %s552_s24  ;;  %p557_p7 = scmp.lt.u32.totalorder %s812_s5, %s863_s2 }
 0x136   : > { %p558_p3 = scmp.lt.u32.totalorder %s556_s30, %s552_s24  ;;  %p560_p11 = scmp.lt.u32.totalorder %s552_s24, %s812_s5 }
 0x137   : > { %p554_p4 = pnand %p553_p10, %p746_p13 }
 0x138   : > { %p559_p2 = por %p558_p3, %p557_p7 }
 0x139   : > { %p555_p1 = pneg %p554_p4 }
 0x13a   : > { %p561_p6 = por %p560_p11, %p559_p2 }
 0x13c   : > { %p562_p8 = pnand %p561_p6, %p555_p1 }
 0x13e   : > { %565 = shalt.err (!%p562_p8)
}
 0x13f   : > { %412 = dma.vmem_to_hbm [thread:$0]  (%p746_p13), %s814_s3, 256, %s812_s5, %s276_s26  }
 0x140 PF: > { %s304_s7 = sand.u32 1, %s604_s9   ;;  %p882_p9 = scmp.ne.s32.totalorder %s871_s20, 0 }
 0x141   : > { %p883_p12 = scmp.ge.s32.totalorder %s624_s14, 2  ;;  %s305_s8 = scalar_lea.sflag [#allocation4], %s304_s7 }
 0x143   : > { %p423_p0 = pnand %p883_p12, %p882_p9 }
 0x145   : > { %599 = dma.done.wait (!%p423_p0), %s305_s8, 256  }
 0x146   : > { %601 = vsyncadd (!%p423_p0), %s305_s8, 4294967040  ;;  %s19_s14 = sadd.s32 1, %s624_s14   ;;  %s884_s9 = smov %s608_s10 }
 0x147   : > { %p16_p5 = scmp.ge.s32.totalorder %s19_s14, 4   ;;  %s885_s10 = smov %s612_s11 }
 0x148   : > { %s886_s11 = smov %s754_s28  ;;  %s887_s12 = smov %s620_s13 }
 0x149   : > { %s888_s13 = smov %s890_s25  ;;  %18 = sbr.rel (!%p16_p5) target bundleno = 7 (0x7), region = 77 }
 0x150   :  { %310 = vsyncpa [#allocation3], 1 }
 0x151   :  { %312 = vsyncpa [#allocation3 + $0x1], 1 }
 0x152   :  { %313 = vsyncpa [#allocation6], 1 }
 0x153   :  { %314 = vsyncpa [#allocation4], 1 }
 0x154   :  { %316 = vsyncpa [#allocation4 + $0x1], 1 }

</bundles_post_ra>
